<compile_context>
chip_gen: v5e
topology: v5e:2x2
jax: 0.10.0
libtpu: 0.0.40
codegen_flags: <defaults>
</compile_context>

<pallas_src>
import jax
import jax.numpy as jnp
from jax.experimental import pallas as pl
from jax.experimental.pallas import tpu as pltpu

IN_FEATURES = 8
HIDDEN = 64
OUT_FEATURES = 1

DEFAULT_TILE_B = 4096  # rows per grid step; multiple of 8 (f32 sublane)


def input_layer_kernel(x_ref, w1_ref, b1_ref, w2_ref, b2_ref, o_ref):
    # Linear(8, 64) + ReLU: MXU matmul with f32 accumulation, bias+ReLU on the VPU.
    h = jnp.dot(x_ref[...], w1_ref[...], preferred_element_type=jnp.float32)
    h = jnp.maximum(h + b1_ref[...], 0.0)          # [TILE_B, 64] + [1, 64]
    # Linear(64, 1): keep the f32 accumulator, no narrowing cast before the second dot.
    y = jnp.dot(h, w2_ref[...], preferred_element_type=jnp.float32)
    y = jnp.abs(y + b2_ref[...])                   # [TILE_B, 1] + [1, 1]
    o_ref[...] = y.astype(o_ref.dtype)


def _round_up(n, m):
    return ((n + m - 1) // m) * m


def input_layer(x, w1, b1, w2, b2, *, tile_b=DEFAULT_TILE_B):
    """x: [B, 8] -> [B, 1]. Batch-tiled, double-buffered, weights resident in VMEM."""
    B = x.shape[0]
    # Largest useful tile: multiple of 8, no bigger than the (padded) batch.
    tile_b = min(tile_b, _round_up(B, 8))
    padded_B = _round_up(B, tile_b)
    if padded_B != B:
        x = jnp.pad(x, ((0, padded_B - B), (0, 0)))

    grid = (padded_B // tile_b,)
    itemsize = jnp.dtype(x.dtype).itemsize
    cost = pl.CostEstimate(
        flops=2 * padded_B * (IN_FEATURES * HIDDEN + HIDDEN * OUT_FEATURES),
        transcendentals=0,
        bytes_accessed=(padded_B * IN_FEATURES + padded_B * OUT_FEATURES) * itemsize
        + (IN_FEATURES * HIDDEN + HIDDEN + HIDDEN * OUT_FEATURES + OUT_FEATURES) * 4,
    )

    out = pl.pallas_call(
        input_layer_kernel,
        out_shape=jax.ShapeDtypeStruct((padded_B, OUT_FEATURES), x.dtype),
        grid=grid,
        in_specs=[
            pl.BlockSpec((tile_b, IN_FEATURES), lambda i: (i, 0)),       # x walks batch
            pl.BlockSpec((IN_FEATURES, HIDDEN), lambda i: (0, 0)),       # W1 resident
            pl.BlockSpec((1, HIDDEN), lambda i: (0, 0)),                 # b1 resident
            pl.BlockSpec((HIDDEN, OUT_FEATURES), lambda i: (0, 0)),      # W2 resident
            pl.BlockSpec((1, OUT_FEATURES), lambda i: (0, 0)),           # b2 resident
        ],
        out_specs=pl.BlockSpec((tile_b, OUT_FEATURES), lambda i: (i, 0)),
        compiler_params=pltpu.CompilerParams(
            dimension_semantics=("parallel",)),                          # 2 TCs on v7x
        cost_estimate=cost,
    )(x, w1, b1, w2, b2)

    if padded_B != B:
        out = out[:B]
    return out


def init_params(key):
    """Deterministic init mimicking PyTorch nn.Linear defaults
    (uniform in [-1/sqrt(fan_in), 1/sqrt(fan_in)])."""
    k1, k2, k3, k4 = jax.random.split(key, 4)
    bound1 = 1.0 / jnp.sqrt(IN_FEATURES)
    bound2 = 1.0 / jnp.sqrt(HIDDEN)
    w1 = jax.random.uniform(k1, (IN_FEATURES, HIDDEN), jnp.float32, -bound1, bound1)
    b1 = jax.random.uniform(k2, (1, HIDDEN), jnp.float32, -bound1, bound1)
    w2 = jax.random.uniform(k3, (HIDDEN, OUT_FEATURES), jnp.float32, -bound2, bound2)
    b2 = jax.random.uniform(k4, (1, OUT_FEATURES), jnp.float32, -bound2, bound2)
    return w1, b1, w2, b2


def reference(x, w1, b1, w2, b2):
    h = jnp.maximum(x @ w1 + b1, 0.0)
    return jnp.abs(h @ w2 + b2)


if __name__ == "__main__":
    key = jax.random.PRNGKey(0)
    kx, kp = jax.random.split(key)
    batch = 8
    x = jax.random.normal(kx, (batch, IN_FEATURES), jnp.float32)
    w1, b1, w2, b2 = init_params(kp)

    out = input_layer(x, w1, b1, w2, b2)
    out = jax.block_until_ready(out)

    ref = reference(x, w1, b1, w2, b2)
    assert out.shape == (batch, OUT_FEATURES)
    assert jnp.allclose(out, ref, atol=1e-5, rtol=1e-5)
    print("KERNEL_OK")
</pallas_src>

<mosaic_0001>
module attributes {stable_mosaic.version = 11 : i64} {
  func.func @input_layer_kernel(%arg0: i32, %arg1: memref<8x8xf32, #tpu.memory_space<vmem>>, %arg2: memref<8x64xf32, #tpu.memory_space<vmem>>, %arg3: memref<1x64xf32, #tpu.memory_space<vmem>>, %arg4: memref<64x1xf32, #tpu.memory_space<vmem>>, %arg5: memref<1x1xf32, #tpu.memory_space<vmem>>, %arg6: memref<8x1xf32, #tpu.memory_space<vmem>>) attributes {dimension_semantics = [#tpu.dimension_semantics<parallel>], iteration_bounds = array<i64: 1>, scalar_prefetch = 0 : i64, scratch_operands = 0 : i64, tpu.core_type = #tpu.core_type<tc>, window_params = [{transform_indices = @transform_0, window_bounds = array<i64: 8, 8>}, {pipeline_mode = #tpu.pipeline_mode<synchronous>, transform_indices = @transform_1, window_bounds = array<i64: 8, 64>}, {pipeline_mode = #tpu.pipeline_mode<synchronous>, transform_indices = @transform_2, window_bounds = array<i64: 1, 64>}, {pipeline_mode = #tpu.pipeline_mode<synchronous>, transform_indices = @transform_3, window_bounds = array<i64: 64, 1>}, {pipeline_mode = #tpu.pipeline_mode<synchronous>, transform_indices = @transform_4, window_bounds = array<i64: 1, 1>}, {transform_indices = @transform_5, window_bounds = array<i64: 8, 1>}]} {
    %c0 = arith.constant 0 : index
    %c0_0 = arith.constant 0 : index
    %0 = vector.load %arg1[%c0, %c0_0] : memref<8x8xf32, #tpu.memory_space<vmem>>, vector<8x8xf32>
    %c0_1 = arith.constant 0 : index
    %c0_2 = arith.constant 0 : index
    %1 = vector.load %arg2[%c0_1, %c0_2] : memref<8x64xf32, #tpu.memory_space<vmem>>, vector<8x64xf32>
    %cst = arith.constant dense<0.000000e+00> : vector<8x64xf32>
    %2 = tpu.matmul %0, %1, %cst {dimension_numbers = #tpu.dot_dimension_numbers<[1], [0], [0], [1], [0, 0, 1, 1], [], []>} : vector<8x8xf32>, vector<8x64xf32>, vector<8x64xf32> -> vector<8x64xf32>
    %c0_3 = arith.constant 0 : index
    %c0_4 = arith.constant 0 : index
    %3 = vector.load %arg3[%c0_3, %c0_4] : memref<1x64xf32, #tpu.memory_space<vmem>>, vector<1x64xf32>
    %4 = vector.broadcast %3 : vector<1x64xf32> to vector<8x64xf32>
    %5 = arith.addf %2, %4 : vector<8x64xf32>
    %cst_5 = arith.constant 0.000000e+00 : f32
    %6 = vector.broadcast %cst_5 : f32 to vector<8x64xf32>
    %7 = arith.maximumf %5, %6 : vector<8x64xf32>
    %c0_6 = arith.constant 0 : index
    %c0_7 = arith.constant 0 : index
    %8 = vector.load %arg4[%c0_6, %c0_7] : memref<64x1xf32, #tpu.memory_space<vmem>>, vector<64x1xf32>
    %cst_8 = arith.constant dense<0.000000e+00> : vector<8x1xf32>
    %9 = tpu.matmul %7, %8, %cst_8 {dimension_numbers = #tpu.dot_dimension_numbers<[1], [0], [0], [1], [0, 0, 1, 1], [], []>} : vector<8x64xf32>, vector<64x1xf32>, vector<8x1xf32> -> vector<8x1xf32>
    %c0_9 = arith.constant 0 : index
    %c0_10 = arith.constant 0 : index
    %10 = vector.load %arg5[%c0_9, %c0_10] : memref<1x1xf32, #tpu.memory_space<vmem>>, vector<1x1xf32>
    %11 = vector.broadcast %10 : vector<1x1xf32> to vector<8x1xf32>
    %12 = arith.addf %9, %11 : vector<8x1xf32>
    %13 = math.absf %12 : vector<8x1xf32>
    %c0_11 = arith.constant 0 : index
    %c0_12 = arith.constant 0 : index
    %14 = vector.load %arg6[%c0_11, %c0_12] : memref<8x1xf32, #tpu.memory_space<vmem>>, vector<8x1xf32>
    tpu.vector_store %arg6[%c0_11, %c0_12], %13 {strides = array<i32>} : memref<8x1xf32, #tpu.memory_space<vmem>>, vector<8x1xf32>,
    return
  }
  func.func @transform_0(%arg0: i32) -> (i32, i32) {
    %c0_i32 = arith.constant 0 : i32
    %c0_i32_0 = arith.constant 0 : i32
    return %arg0, %c0_i32 : i32, i32
  }
  func.func @transform_1(%arg0: i32) -> (i32, i32) {
    %c0_i32 = arith.constant 0 : i32
    %c0_i32_0 = arith.constant 0 : i32
    %c0_i32_1 = arith.constant 0 : i32
    return %c0_i32, %c0_i32_0 : i32, i32
  }
  func.func @transform_2(%arg0: i32) -> (i32, i32) {
    %c0_i32 = arith.constant 0 : i32
    %c0_i32_0 = arith.constant 0 : i32
    %c0_i32_1 = arith.constant 0 : i32
    return %c0_i32, %c0_i32_0 : i32, i32
  }
  func.func @transform_3(%arg0: i32) -> (i32, i32) {
    %c0_i32 = arith.constant 0 : i32
    %c0_i32_0 = arith.constant 0 : i32
    %c0_i32_1 = arith.constant 0 : i32
    return %c0_i32, %c0_i32_0 : i32, i32
  }
  func.func @transform_4(%arg0: i32) -> (i32, i32) {
    %c0_i32 = arith.constant 0 : i32
    %c0_i32_0 = arith.constant 0 : i32
    %c0_i32_1 = arith.constant 0 : i32
    return %c0_i32, %c0_i32_0 : i32, i32
  }
  func.func @transform_5(%arg0: i32) -> (i32, i32) {
    %c0_i32 = arith.constant 0 : i32
    %c0_i32_0 = arith.constant 0 : i32
    return %arg0, %c0_i32 : i32, i32
  }
}

</mosaic_0001>

<bundles_post_ra>
// kernel: tpu_custom_call.1
= control target key start
LH: loop header
LB: loop body
LE: loop exit
PB: predicated region body
PF: predicated region fallthrough
CT: control target
= control target key end

     0   :  { %vm28_vm0 = vcmask 64512   ;;  %vm65_vm1 = vcmask 523264   ;;  %vm90_vm2 = vcmask 7168   ;;  %s169_s1 = inlined_call_operand.vmem [shape: f32[8,64], index: 1, kind: input, shape index: {}]   ;;  %s170_s0 = inlined_call_operand.vmem [shape: f32[8,8], index: 0, kind: input, shape index: {}]   ;;  %s171_s3 = inlined_call_operand.vmem [shape: f32[64,1], index: 3, kind: input, shape index: {}]   ;;  %s172_s2 = inlined_call_operand.vmem [shape: f32[1,64], index: 2, kind: input, shape index: {}]   ;;  %s173_s4 = inlined_call_operand.<no memory space> [shape: f32[1,1], index: 4, kind: input, shape index: {}]   ;;  %s174_s5 = inlined_call_operand.vmem [shape: f32[8,1], index: 5, kind: output, shape index: {}]  }
   0x1   :  { %v23_v0 = vld [vmem:[%s169_s1] sm:$0xff]  ;;  %v60_v2 = vld [vmem:[%s171_s3 + $0x38] sm:$0xff]  ;;  %v59_v3 = vld [vmem:[%s171_s3 + $0x30] sm:$0xff]  ;;  %v10_v10 = vstv %s173_s4 }
   0x2   :  { %v22_v1 = vld [vmem:[%s170_s0] sm:$0xff]  ;;  %47 = vmatpush.msra.mxu0 %v23_v0  ;;  %77 = vmatpush.msra.mxu1 %v60_v2  ;;  %v58_v4 = vld [vmem:[%s171_s3 + $0x28] sm:$0xff]  ;;  %v56_v6 = vld [vmem:[%s171_s3 + $0x18] sm:$0xff]  ;;  %11 = vst [vmem:[#allocation2] sm:$0x1] %v10_v10 }
   0x3   :  { %96 = vmatmul.msk.f32.vlgmr.msra.gmra.mxu0 %vm28_vm0, %v22_v1  ;;  %v57_v5 = vld [vmem:[%s171_s3 + $0x20] sm:$0xff]  ;;  %v55_v7 = vld [vmem:[%s171_s3 + $0x10] sm:$0xff]  ;;  %v54_v8 = vld [vmem:[%s171_s3 + $0x8] sm:$0xff] }
   0x4   :  { %78 = vmatpush.msra.mxu1 %v59_v3  ;;  %v53_v9 = vld [vmem:[%s171_s3] sm:$0xff] }
   0x5   :  { %v98_v11 = vld [vmem:[%s172_s2] ss:$0 sm:$0xff] }
   0x6   :  { %79 = vmatpush.msra.mxu1 %v58_v4 }
   0x8   :  { %80 = vmatpush.msra.mxu1 %v57_v5 }
   0x9   :  { %v99_v15 = vld [vmem:[#allocation2] ss:$0 sm:$0xff] }
   0xa   :  { %81 = vmatpush.msra.mxu1 %v56_v6 }
   0xc   :  { %82 = vmatpush.msra.mxu1 %v55_v7 }
   0xe   :  { %83 = vmatpush.msra.mxu1 %v54_v8 }
  0x10   :  { %84 = vmatpush.msra.mxu1 %v53_v9 }
  0x80   :  { %v49_v12 = vpop.f32.mrf.mxu0 }
  0x81   :  { %v50_v13 = vadd.f32 %v98_v11, %v49_v12 }
  0x83   :  { %v52_v14 = vmax.f32 %v50_v13, 0.0 }
  0x85   :  { %97 = vmatmul.msk.f32.vlgmr.msra.gmra.mxu1 %vm65_vm1, %v52_v14 }
 0x102   :  { %v86_v16 = vpop.f32.mrf.mxu1 }
 0x103   :  { %v87_v17 = vadd.f32 %v99_v15, %v86_v16 }
 0x105   :  { %v89_v18 = vand.u32 2147483647, %v87_v17 }
 0x107   :  { %91 = vst.msk [vmem:[%s174_s5] sm:$0xff] %vm90_vm2, %v89_v18 }

</bundles_post_ra>
